<compile_context>
chip_gen: v7x
topology: tpu7x:2x2x1
jax: 0.10.0
libtpu: 0.0.40
codegen_flags: <defaults>
</compile_context>

<pallas_src>
import jax
import jax.numpy as jnp
from jax.experimental import pallas as pl
from jax.experimental.pallas import tpu as pltpu

BN_EPS = 1e-5

_LANE = 128
_VMEM_LIMIT_BYTES = 32 * 1024 * 1024   # scoped VMEM we request (safe on v5e/v6e/v7x)
_VMEM_BUDGET_BYTES = 24 * 1024 * 1024  # what tile sizing targets (leaves headroom)


def _round_up(x, m):
    return ((x + m - 1) // m) * m


def _choose_tile_m(M, K_pad, C_pad):
    """Largest M-tile (multiple of 16 rows, <=1024) that fits the VMEM budget.

    Pass 1 holds double-buffered bf16 (tile, K_pad) inputs and f32
    (tile, C_pad) outputs plus the resident bf16 weight; pass 2 holds f32
    (tile, C_pad) in/out.  Sized conservatively so it also fits v7x's VMEM.
    """
    fixed = 2 * K_pad * C_pad + 64 * C_pad            # resident wbig + stats/scale/shift
    per_row = max(2 * (2 * K_pad + 4 * C_pad),        # pass 1: bf16 in + f32 out, 2 bufs
                  2 * (4 * C_pad + 4 * C_pad))        # pass 2: f32 in + f32 out, 2 bufs
    tile = (_VMEM_BUDGET_BYTES - fixed) // per_row
    tile = int(max(16, min(tile, 1024)))
    if M <= tile:
        return _round_up(M, 16)
    return (tile // 16) * 16


def _fr_matmul_stats_kernel(x_ref, w_ref, y_ref, stats_ref):
    # ReLU (VPU).  Zero-padded rows/columns stay zero, so they contribute
    # nothing to the matmul or to the BN partial sums.
    h = jnp.maximum(x_ref[...], 0)
    # All strided 1x1 convs + channel concat fused into one MXU matmul against
    # the block-diagonal bf16 weight, f32 accumulation.
    y = jnp.dot(h, w_ref[...], preferred_element_type=jnp.float32)
    y_ref[...] = y
    # Per-tile per-channel partial sums for BatchNorm (XLU reduces; overlap
    # with MXU work of neighbouring pipelined grid steps).
    stats_ref[0, 0:1, :] = jnp.sum(y, axis=0, keepdims=True)
    stats_ref[0, 1:2, :] = jnp.sum(y * y, axis=0, keepdims=True)


def _fr_bn_apply_kernel(y_ref, scale_ref, shift_ref, o_ref):
    # Normalize: scale/shift blocks are grid-invariant (stay resident in VMEM).
    o_ref[...] = y_ref[...] * scale_ref[...] + shift_ref[...]


def factorized_reduce(x, conv_weights, gamma, beta, stride, tile_m=None):
    """Forward pass of FactorizedReduce (training-mode BatchNorm).

    x            : (N, C_in, H, W) float32, NCHW (PyTorch convention).
    conv_weights : list of `stride` arrays, each (C_out_i, C_in, 1, 1).
    gamma, beta  : (C_out,) BatchNorm affine parameters.
    """
    assert stride in (2, 4)
    N, C_in, H, W = x.shape
    H_out = -(-H // stride)
    W_out = -(-W // stride)
    M = N * H_out * W_out
    K = stride * C_in
    C_out = sum(int(w.shape[0]) for w in conv_weights)

    K_pad = _round_up(K, _LANE)        # lane-dense LHS / full MXU K panels
    C_pad = _round_up(C_out, _LANE)    # lane-dense (unmasked) output stores
    if tile_m is None:
        tile_m = _choose_tile_m(M, K_pad, C_pad)
    assert tile_m > 0 and tile_m % 16 == 0
    M_pad = _round_up(M, tile_m)
    num_tiles = M_pad // tile_m

    # ---- im2col-style input: single NHWC transpose, bf16 halves HBM read ----
    x_nhwc = jnp.transpose(x, (0, 2, 3, 1))
    x_nhwc = jnp.pad(
        x_nhwc,
        ((0, 0), (0, stride * H_out - H), (0, stride * W_out - W), (0, 0)))
    x6 = x_nhwc.reshape(N, H_out, stride, W_out, stride, C_in)
    slabs = [x6[:, :, i, :, i, :] for i in range(stride)]   # conv i's pixels
    xbig = jnp.stack(slabs, axis=3).reshape(M, K).astype(jnp.bfloat16)
    xbig = jnp.pad(xbig, ((0, M_pad - M), (0, K_pad - K)))  # zero rows/cols

    # ---- block-diagonal weight (K_pad, C_pad), bf16, no repeated .at[].set --
    cols = []
    for i, w in enumerate(conv_weights):
        co = int(w.shape[0])
        blk = w.reshape(co, C_in).T.astype(jnp.float32)     # (C_in, co)
        cols.append(jnp.pad(blk, ((i * C_in, K_pad - (i + 1) * C_in), (0, 0))))
    wbig = jnp.concatenate(cols, axis=1)                    # (K_pad, C_out)
    wbig = jnp.pad(wbig, ((0, 0), (0, C_pad - C_out))).astype(jnp.bfloat16)

    gamma_p = jnp.pad(gamma.astype(jnp.float32), (0, C_pad - C_out))
    beta_p = jnp.pad(beta.astype(jnp.float32), (0, C_pad - C_out))

    cparams = pltpu.CompilerParams(
        dimension_semantics=("parallel",),          # M tiles split across TCs (v7x)
        vmem_limit_bytes=_VMEM_LIMIT_BYTES)

    # ---- pass 1: ReLU + fused strided 1x1 convs + BN partial sums -----------
    y_pad, partial = pl.pallas_call(
        _fr_matmul_stats_kernel,
        grid=(num_tiles,),
        in_specs=[
            pl.BlockSpec((tile_m, K_pad), lambda i: (i, 0)),
            pl.BlockSpec((K_pad, C_pad), lambda i: (0, 0)),   # resident weight
        ],
        out_specs=[
            pl.BlockSpec((tile_m, C_pad), lambda i: (i, 0)),
            pl.BlockSpec((1, 2, C_pad), lambda i: (i, 0, 0)),
        ],
        out_shape=[
            jax.ShapeDtypeStruct((M_pad, C_pad), jnp.float32),
            jax.ShapeDtypeStruct((num_tiles, 2, C_pad), jnp.float32),
        ],
        compiler_params=cparams,
    )(xbig, wbig)

    # ---- tiny stats combine (training-mode BN: biased variance over M rows) -
    ch_sum = jnp.sum(partial[:, 0, :], axis=0)
    ch_sqs = jnp.sum(partial[:, 1, :], axis=0)
    mean = ch_sum / M                     # divide by true M: padded rows are 0
    var = jnp.maximum(ch_sqs / M - mean * mean, 0.0)   # clamp cancellation
    inv = jax.lax.rsqrt(var + BN_EPS)
    scale = (gamma_p * inv).reshape(1, C_pad)
    shift = (beta_p - mean * gamma_p * inv).reshape(1, C_pad)

    # ---- pass 2: normalize y in place (lane-dense stores, aliased buffer) ---
    out_pad = pl.pallas_call(
        _fr_bn_apply_kernel,
        grid=(num_tiles,),
        in_specs=[
            pl.BlockSpec((tile_m, C_pad), lambda i: (i, 0)),
            pl.BlockSpec((1, C_pad), lambda i: (0, 0)),       # resident scale
            pl.BlockSpec((1, C_pad), lambda i: (0, 0)),       # resident shift
        ],
        out_specs=pl.BlockSpec((tile_m, C_pad), lambda i: (i, 0)),
        out_shape=jax.ShapeDtypeStruct((M_pad, C_pad), jnp.float32),
        input_output_aliases={0: 0},
        compiler_params=cparams,
    )(y_pad, scale, shift)

    out = out_pad[:M, :C_out].reshape(N, H_out, W_out, C_out)
    return jnp.transpose(out, (0, 3, 1, 2))      # back to NCHW


def _reference(x, conv_weights, gamma, beta, stride):
    """Pure-JAX f32 reference mirroring the PyTorch forward (training-mode BN)."""
    N, C_in, H, W = x.shape
    xr = jnp.maximum(x, 0.0)
    pad = stride - 1
    y = jnp.pad(xr, ((0, 0), (0, 0), (0, pad), (0, pad)))
    outs = []
    for i, w in enumerate(conv_weights):
        xi = y[:, :, i:i + H, i:i + W][:, :, ::stride, ::stride]
        outs.append(jnp.einsum('oc,nchw->nohw',
                               w.reshape(w.shape[0], C_in), xi,
                               precision=jax.lax.Precision.HIGHEST))
    out = jnp.concatenate(outs, axis=1)
    mean = out.mean(axis=(0, 2, 3), keepdims=True)
    var = ((out - mean) ** 2).mean(axis=(0, 2, 3), keepdims=True)
    out = (out - mean) / jnp.sqrt(var + BN_EPS)
    return out * gamma.reshape(1, -1, 1, 1) + beta.reshape(1, -1, 1, 1)


if __name__ == "__main__":
    fr = jax.jit(factorized_reduce, static_argnames=("stride", "tile_m"))
    key = jax.random.PRNGKey(0)

    # ---- case 1: stride=2, C_in=4 -> C_out=8, 16x16, default (single) tile --
    k1, k2, key = jax.random.split(key, 3)
    N, C_in, C_out, H, W, stride = 2, 4, 8, 16, 16, 2
    x = jax.random.normal(k1, (N, C_in, H, W), dtype=jnp.float32)
    c_outs = [C_out // 2, C_out - C_out // 2]
    ws = [jax.random.normal(k, (co, C_in, 1, 1), jnp.float32) * 0.5
          for k, co in zip(jax.random.split(k2, len(c_outs)), c_outs)]
    gamma = jnp.ones((C_out,), jnp.float32)    # BatchNorm2d default init
    beta = jnp.zeros((C_out,), jnp.float32)

    out = jax.block_until_ready(fr(x, ws, gamma, beta, stride=stride))
    ref = _reference(x, ws, gamma, beta, stride)
    assert out.shape == (N, C_out, H // stride, W // stride), out.shape
    # bf16-input / f32-accumulate MXU matmul (standard TPU conv precision) vs.
    # a strict-f32 reference -> percent-level agreement expected.
    assert jnp.allclose(out, ref, rtol=3e-2, atol=3e-2), \
        float(jnp.max(jnp.abs(out - ref)))
    # Precision-independent BN invariant: per-channel batch mean == beta.
    assert jnp.allclose(out.mean(axis=(0, 2, 3)), beta, atol=1e-3)

    # ---- case 2: stride=4, multi-tile grid (tile_m=64 -> 2 tiles), affine ---
    k1, k2, k3, k4 = jax.random.split(key, 4)
    N, C_in, C_out, H, W, stride = 2, 8, 16, 32, 32, 4
    x = jax.random.normal(k1, (N, C_in, H, W), dtype=jnp.float32)
    ws = [jax.random.normal(k, (C_out // 4, C_in, 1, 1), jnp.float32) * 0.5
          for k in jax.random.split(k2, 4)]
    gamma = 1.0 + 0.1 * jax.random.normal(k3, (C_out,), jnp.float32)
    beta = 0.1 * jax.random.normal(k4, (C_out,), jnp.float32)

    out = jax.block_until_ready(fr(x, ws, gamma, beta, stride=stride, tile_m=64))
    ref = _reference(x, ws, gamma, beta, stride)
    assert out.shape == (N, C_out, H // stride, W // stride), out.shape
    assert jnp.allclose(out, ref, rtol=3e-2, atol=3e-2), \
        float(jnp.max(jnp.abs(out - ref)))
    assert jnp.allclose(out.mean(axis=(0, 2, 3)), beta, atol=1e-3)

    print("KERNEL_OK")
</pallas_src>

<mosaic_0001>
module attributes {stable_mosaic.version = 11 : i64} {
  func.func @_fr_matmul_stats_kernel(%arg0: i32, %arg1: memref<128x128xbf16, #tpu.memory_space<vmem>>, %arg2: memref<128x128xbf16, #tpu.memory_space<vmem>>, %arg3: memref<128x128xf32, #tpu.memory_space<vmem>>, %arg4: memref<1x2x128xf32, #tpu.memory_space<vmem>>) attributes {dimension_semantics = [#tpu.dimension_semantics<parallel>], iteration_bounds = array<i64: 1>, scalar_prefetch = 0 : i64, scratch_operands = 0 : i64, tpu.core_type = #tpu.core_type<tc>, window_params = [{transform_indices = @transform_0, window_bounds = array<i64: 128, 128>}, {pipeline_mode = #tpu.pipeline_mode<synchronous>, transform_indices = @transform_1, window_bounds = array<i64: 128, 128>}, {transform_indices = @transform_2, window_bounds = array<i64: 128, 128>}, {transform_indices = @transform_3, window_bounds = array<i64: 1, 2, 128>}]} {
    %c0 = arith.constant 0 : index
    %c0_0 = arith.constant 0 : index
    %0 = vector.load %arg1[%c0, %c0_0] : memref<128x128xbf16, #tpu.memory_space<vmem>>, vector<128x128xbf16>
    %cst = arith.constant 0.000000e+00 : bf16
    %1 = vector.broadcast %cst : bf16 to vector<128x128xbf16>
    %2 = arith.maximumf %0, %1 : vector<128x128xbf16>
    %c0_1 = arith.constant 0 : index
    %c0_2 = arith.constant 0 : index
    %3 = vector.load %arg2[%c0_1, %c0_2] : memref<128x128xbf16, #tpu.memory_space<vmem>>, vector<128x128xbf16>
    %cst_3 = arith.constant dense<0.000000e+00> : vector<128x128xf32>
    %4 = tpu.matmul %2, %3, %cst_3 {dimension_numbers = #tpu.dot_dimension_numbers<[1], [0], [0], [1], [0, 0, 1, 1], [], []>} : vector<128x128xbf16>, vector<128x128xbf16>, vector<128x128xf32> -> vector<128x128xf32>
    %c0_4 = arith.constant 0 : index
    %c0_5 = arith.constant 0 : index
    %5 = vector.load %arg3[%c0_4, %c0_5] : memref<128x128xf32, #tpu.memory_space<vmem>>, vector<128x128xf32>
    tpu.vector_store %arg3[%c0_4, %c0_5], %4 {strides = array<i32>} : memref<128x128xf32, #tpu.memory_space<vmem>>, vector<128x128xf32>,
    %cst_6 = arith.constant dense<0.000000e+00> : vector<128xf32>
    %6 = vector.multi_reduction <add>, %4, %cst_6 [0] : vector<128x128xf32> to vector<128xf32>
    %7 = vector.shape_cast %6 : vector<128xf32> to vector<1x128xf32>
    %c0_7 = arith.constant 0 : index
    %c0_8 = arith.constant 0 : index
    %c0_9 = arith.constant 0 : index
    %8 = vector.load %arg4[%c0_7, %c0_8, %c0_9] : memref<1x2x128xf32, #tpu.memory_space<vmem>>, vector<1x1x128xf32>
    %9 = vector.shape_cast %8 : vector<1x1x128xf32> to vector<1x128xf32>
    %10 = vector.shape_cast %7 : vector<1x128xf32> to vector<1x1x128xf32>
    tpu.vector_store %arg4[%c0_7, %c0_8, %c0_9], %10 {strides = array<i32>} : memref<1x2x128xf32, #tpu.memory_space<vmem>>, vector<1x1x128xf32>,
    %11 = arith.mulf %4, %4 : vector<128x128xf32>
    %cst_10 = arith.constant dense<0.000000e+00> : vector<128xf32>
    %12 = vector.multi_reduction <add>, %11, %cst_10 [0] : vector<128x128xf32> to vector<128xf32>
    %13 = vector.shape_cast %12 : vector<128xf32> to vector<1x128xf32>
    %c0_11 = arith.constant 0 : index
    %c1 = arith.constant 1 : index
    %c0_12 = arith.constant 0 : index
    %14 = vector.load %arg4[%c0_11, %c1, %c0_12] : memref<1x2x128xf32, #tpu.memory_space<vmem>>, vector<1x1x128xf32>
    %15 = vector.shape_cast %14 : vector<1x1x128xf32> to vector<1x128xf32>
    %16 = vector.shape_cast %13 : vector<1x128xf32> to vector<1x1x128xf32>
    tpu.vector_store %arg4[%c0_11, %c1, %c0_12], %16 {strides = array<i32>} : memref<1x2x128xf32, #tpu.memory_space<vmem>>, vector<1x1x128xf32>,
    return
  }
  func.func @transform_0(%arg0: i32) -> (i32, i32) {
    %c0_i32 = arith.constant 0 : i32
    %c0_i32_0 = arith.constant 0 : i32
    return %arg0, %c0_i32 : i32, i32
  }
  func.func @transform_1(%arg0: i32) -> (i32, i32) {
    %c0_i32 = arith.constant 0 : i32
    %c0_i32_0 = arith.constant 0 : i32
    %c0_i32_1 = arith.constant 0 : i32
    return %c0_i32, %c0_i32_0 : i32, i32
  }
  func.func @transform_2(%arg0: i32) -> (i32, i32) {
    %c0_i32 = arith.constant 0 : i32
    %c0_i32_0 = arith.constant 0 : i32
    return %arg0, %c0_i32 : i32, i32
  }
  func.func @transform_3(%arg0: i32) -> (i32, i32, i32) {
    %c0_i32 = arith.constant 0 : i32
    %c0_i32_0 = arith.constant 0 : i32
    %c0_i32_1 = arith.constant 0 : i32
    return %arg0, %c0_i32, %c0_i32_0 : i32, i32, i32
  }
}

module attributes {stable_mosaic.version = 11 : i64} {
  func.func @_fr_bn_apply_kernel(%arg0: i32, %arg1: memref<128x128xf32, #tpu.memory_space<vmem>>, %arg2: memref<1x128xf32, #tpu.memory_space<vmem>>, %arg3: memref<1x128xf32, #tpu.memory_space<vmem>>, %arg4: memref<128x128xf32, #tpu.memory_space<vmem>>) attributes {dimension_semantics = [#tpu.dimension_semantics<parallel>], iteration_bounds = array<i64: 1>, scalar_prefetch = 0 : i64, scratch_operands = 0 : i64, tpu.core_type = #tpu.core_type<tc>, window_params = [{transform_indices = @transform_0, window_bounds = array<i64: 128, 128>}, {pipeline_mode = #tpu.pipeline_mode<synchronous>, transform_indices = @transform_1, window_bounds = array<i64: 1, 128>}, {pipeline_mode = #tpu.pipeline_mode<synchronous>, transform_indices = @transform_2, window_bounds = array<i64: 1, 128>}, {transform_indices = @transform_3, window_bounds = array<i64: 128, 128>}]} {
    %c0 = arith.constant 0 : index
    %c0_0 = arith.constant 0 : index
    %0 = vector.load %arg1[%c0, %c0_0] : memref<128x128xf32, #tpu.memory_space<vmem>>, vector<128x128xf32>
    %c0_1 = arith.constant 0 : index
    %c0_2 = arith.constant 0 : index
    %1 = vector.load %arg2[%c0_1, %c0_2] : memref<1x128xf32, #tpu.memory_space<vmem>>, vector<1x128xf32>
    %2 = vector.broadcast %1 : vector<1x128xf32> to vector<128x128xf32>
    %3 = arith.mulf %0, %2 : vector<128x128xf32>
    %c0_3 = arith.constant 0 : index
    %c0_4 = arith.constant 0 : index
    %4 = vector.load %arg3[%c0_3, %c0_4] : memref<1x128xf32, #tpu.memory_space<vmem>>, vector<1x128xf32>
    %5 = vector.broadcast %4 : vector<1x128xf32> to vector<128x128xf32>
    %6 = arith.addf %3, %5 : vector<128x128xf32>
    %c0_5 = arith.constant 0 : index
    %c0_6 = arith.constant 0 : index
    %7 = vector.load %arg4[%c0_5, %c0_6] : memref<128x128xf32, #tpu.memory_space<vmem>>, vector<128x128xf32>
    tpu.vector_store %arg4[%c0_5, %c0_6], %6 {strides = array<i32>} : memref<128x128xf32, #tpu.memory_space<vmem>>, vector<128x128xf32>,
    return
  }
  func.func @transform_0(%arg0: i32) -> (i32, i32) {
    %c0_i32 = arith.constant 0 : i32
    %c0_i32_0 = arith.constant 0 : i32
    return %arg0, %c0_i32 : i32, i32
  }
  func.func @transform_1(%arg0: i32) -> (i32, i32) {
    %c0_i32 = arith.constant 0 : i32
    %c0_i32_0 = arith.constant 0 : i32
    %c0_i32_1 = arith.constant 0 : i32
    return %c0_i32, %c0_i32_0 : i32, i32
  }
  func.func @transform_2(%arg0: i32) -> (i32, i32) {
    %c0_i32 = arith.constant 0 : i32
    %c0_i32_0 = arith.constant 0 : i32
    %c0_i32_1 = arith.constant 0 : i32
    return %c0_i32, %c0_i32_0 : i32, i32
  }
  func.func @transform_3(%arg0: i32) -> (i32, i32) {
    %c0_i32 = arith.constant 0 : i32
    %c0_i32_0 = arith.constant 0 : i32
    return %arg0, %c0_i32 : i32, i32
  }
}

</mosaic_0001>

<bundles_post_ra>
// kernel: factorized_reduce.3
= control target key start
LH: loop header
LB: loop body
LE: loop exit
PB: predicated region body
PF: predicated region fallthrough
CT: control target
= control target key end

     0   :  { %s220_s0 = inlined_call_operand.vmem [shape: f32[128,128], index: 0, kind: input, shape index: {}, may-alias: {0,3}]   ;;  %s221_s1 = inlined_call_operand.vmem [shape: f32[1,128], index: 1, kind: input, shape index: {}]   ;;  %s222_s2 = inlined_call_operand.vmem [shape: f32[1,128], index: 2, kind: input, shape index: {}]   ;;  %s223_s3 = inlined_call_operand.vmem [shape: f32[128,128], index: 3, kind: output, shape index: {}, may-alias: {0,3}]  }
   0x1   :  { %v14_v0 = vld [vmem:[%s220_s0] sm:$0xff]  ;;  %v15_v4 = vld [vmem:[%s220_s0 + $0x8] sm:$0xff]  ;;  %v16_v5 = vld [vmem:[%s220_s0 + $0x10] sm:$0xff] }
   0x2   :  { %v96_v1 = vld [vmem:[%s221_s1] ss:$0 sm:$0xff]  ;;  %v17_v6 = vld [vmem:[%s220_s0 + $0x18] sm:$0xff]  ;;  %v19_v11 = vld [vmem:[%s220_s0 + $0x28] sm:$0xff] }
   0x3   :  { %v97_v2 = vld [vmem:[%s222_s2] ss:$0 sm:$0xff]  ;;  %v37_v3 = vmul.f32 %v96_v1, %v14_v0  ;;  %v38_v7 = vmul.f32 %v96_v1, %v15_v4  ;;  %v39_v8 = vmul.f32 %v96_v1, %v16_v5  ;;  %v40_v9 = vmul.f32 %v96_v1, %v17_v6  ;;  %v20_v12 = vld [vmem:[%s220_s0 + $0x30] sm:$0xff]  ;;  %v21_v17 = vld [vmem:[%s220_s0 + $0x38] sm:$0xff] }
   0x4   :  { %v18_v10 = vld [vmem:[%s220_s0 + $0x20] sm:$0xff]  ;;  %v42_v15 = vmul.f32 %v96_v1, %v19_v11  ;;  %v43_v16 = vmul.f32 %v96_v1, %v20_v12  ;;  %v23_v19 = vld [vmem:[%s220_s0 + $0x48] sm:$0xff]  ;;  %v44_v23 = vmul.f32 %v96_v1, %v21_v17  ;;  %v24_v24 = vld [vmem:[%s220_s0 + $0x50] sm:$0xff] }
   0x5   :  { %v60_v13 = vadd.f32 %v97_v2, %v37_v3  ;;  %v41_v14 = vmul.f32 %v96_v1, %v18_v10  ;;  %v22_v18 = vld [vmem:[%s220_s0 + $0x40] sm:$0xff]  ;;  %v61_v20 = vadd.f32 %v97_v2, %v38_v7  ;;  %v62_v21 = vadd.f32 %v97_v2, %v39_v8  ;;  %v25_v25 = vld [vmem:[%s220_s0 + $0x58] sm:$0xff] }
   0x6   :  { %v63_v22 = vadd.f32 %v97_v2, %v40_v9  ;;  %v26_v26 = vld [vmem:[%s220_s0 + $0x60] sm:$0xff]  ;;  %v65_v28 = vadd.f32 %v97_v2, %v42_v15  ;;  %v66_v29 = vadd.f32 %v97_v2, %v43_v16  ;;  %v45_v30 = vmul.f32 %v96_v1, %v22_v18 }
   0x7   :  { %76 = vst [vmem:[%s223_s3] sm:$0xff] %v60_v13  ;;  %v64_v27 = vadd.f32 %v97_v2, %v41_v14  ;;  %v67_v34 = vadd.f32 %v97_v2, %v44_v23  ;;  %v46_v35 = vmul.f32 %v96_v1, %v23_v19  ;;  %v47_v36 = vmul.f32 %v96_v1, %v24_v24 }
   0x8   :  { %v48_v37 = vmul.f32 %v96_v1, %v25_v25  ;;  %v68_v38 = vadd.f32 %v97_v2, %v45_v30  ;;  %v49_v39 = vmul.f32 %v96_v1, %v26_v26 }
   0x9   :  { %v69_v42 = vadd.f32 %v97_v2, %v46_v35  ;;  %v70_v43 = vadd.f32 %v97_v2, %v47_v36 }
   0xa   :  { %v71_v44 = vadd.f32 %v97_v2, %v48_v37  ;;  %v72_v46 = vadd.f32 %v97_v2, %v49_v39 }
   0xe   :  { %v27_v31 = vld [vmem:[%s220_s0 + $0x68] sm:$0xff]  ;;  %v28_v32 = vld [vmem:[%s220_s0 + $0x70] sm:$0xff]  ;;  %v29_v33 = vld [vmem:[%s220_s0 + $0x78] sm:$0xff] }
   0xf   :  { %77 = vst [vmem:[%s223_s3 + $0x8] sm:$0xff] %v61_v20  ;;  %78 = vst [vmem:[%s223_s3 + $0x10] sm:$0xff] %v62_v21  ;;  %v50_v40 = vmul.f32 %v96_v1, %v27_v31  ;;  %v51_v41 = vmul.f32 %v96_v1, %v28_v32  ;;  %v52_v45 = vmul.f32 %v96_v1, %v29_v33 }
  0x10   :  { %79 = vst [vmem:[%s223_s3 + $0x18] sm:$0xff] %v63_v22  ;;  %80 = vst [vmem:[%s223_s3 + $0x20] sm:$0xff] %v64_v27 }
  0x11   :  { %81 = vst [vmem:[%s223_s3 + $0x28] sm:$0xff] %v65_v28  ;;  %82 = vst [vmem:[%s223_s3 + $0x30] sm:$0xff] %v66_v29  ;;  %v73_v47 = vadd.f32 %v97_v2, %v50_v40  ;;  %v74_v48 = vadd.f32 %v97_v2, %v51_v41  ;;  %v75_v49 = vadd.f32 %v97_v2, %v52_v45 }
  0x12   :  { %83 = vst [vmem:[%s223_s3 + $0x38] sm:$0xff] %v67_v34  ;;  %84 = vst [vmem:[%s223_s3 + $0x40] sm:$0xff] %v68_v38 }
  0x13   :  { %85 = vst [vmem:[%s223_s3 + $0x48] sm:$0xff] %v69_v42  ;;  %86 = vst [vmem:[%s223_s3 + $0x50] sm:$0xff] %v70_v43 }
  0x14   :  { %87 = vst [vmem:[%s223_s3 + $0x58] sm:$0xff] %v71_v44  ;;  %88 = vst [vmem:[%s223_s3 + $0x60] sm:$0xff] %v72_v46 }
  0x15   :  { %89 = vst [vmem:[%s223_s3 + $0x68] sm:$0xff] %v73_v47  ;;  %90 = vst [vmem:[%s223_s3 + $0x70] sm:$0xff] %v74_v48 }
  0x16   :  { %91 = vst [vmem:[%s223_s3 + $0x78] sm:$0xff] %v75_v49 }

// kernel: factorized_reduce.2
= control target key start
LH: loop header
LB: loop body
LE: loop exit
PB: predicated region body
PF: predicated region fallthrough
CT: control target
= control target key end

     0   :  { %v428_v6 = vmov 0   ;;  %s591_s1 = inlined_call_operand.vmem [shape: bf16[128,128], index: 1, kind: input, shape index: {}]   ;;  %s592_s0 = inlined_call_operand.vmem [shape: bf16[128,128], index: 0, kind: input, shape index: {}]   ;;  %s593_s2 = inlined_call_operand.vmem [shape: f32[128,128], index: 2, kind: output, shape index: {0}]   ;;  %s594_s3 = inlined_call_operand.vmem [shape: f32[1,2,128], index: 3, kind: output, shape index: {1}]  }
   0x1   :  { %v420_v0 = vld [vmem:[%s591_s1] sm:$0xff]   ;;  %v421_v1 = vld [vmem:[%s591_s1 + $0x8] sm:$0xff]   ;;  %v422_v2 = vld [vmem:[%s591_s1 + $0x10] sm:$0xff]  }
   0x2   :  { %371 = vmatprep.subr.bf16.mxu0 %v420_v0  ;;  %403 = vmatprep.subr.bf16.mxu1 %v420_v0  ;;  %v423_v3 = vld [vmem:[%s591_s1 + $0x18] sm:$0xff]   ;;  %v14_v4 = vld [vmem:[%s592_s0] sm:$0xf]  ;;  %v15_v5 = vld [vmem:[%s592_s0 + $0x4] sm:$0xf] }
   0x3   :  { %372 = vmatpush3.bf16.msra.mxu0 %v420_v0  ;;  %411 = vmatpush3.bf16.msra.mxu1 %v420_v0  ;;  %v30_v7 = vmax.bf16 %v428_v6, %v14_v4  ;;  %v31_v8 = vmax.bf16 %v428_v6, %v15_v5  ;;  %v22_v9 = vld [vmem:[%s592_s0 + $0x20] sm:$0xf]  ;;  %v23_v11 = vld [vmem:[%s592_s0 + $0x24] sm:$0xf]  ;;  %v425_v16 = vld [vmem:[%s591_s1 + $0x28] sm:$0xff]  }
   0x4   :  { %373 = vmatprep.subr.bf16.mxu0 %v421_v1  ;;  %404 = vmatprep.subr.bf16.mxu1 %v421_v1  ;;  %v424_v12 = vld [vmem:[%s591_s1 + $0x20] sm:$0xff]   ;;  %v38_v13 = vmax.bf16 %v428_v6, %v22_v9  ;;  %v39_v14 = vmax.bf16 %v428_v6, %v23_v11  ;;  %v426_v17 = vld [vmem:[%s591_s1 + $0x30] sm:$0xff]   ;;  %v427_v18 = vld [vmem:[%s591_s1 + $0x38] sm:$0xff]  }
   0x5   :  { %v339_v10 = vcombine.low %v30_v7, %v31_v8  ;;  %v16_v19 = vld [vmem:[%s592_s0 + $0x8] sm:$0xf]  ;;  %v17_v20 = vld [vmem:[%s592_s0 + $0xc] sm:$0xf]  ;;  %v18_v21 = vld [vmem:[%s592_s0 + $0x10] sm:$0xf] }
   0x6   :  { %v343_v15 = vcombine.low %v38_v13, %v39_v14  ;;  %v24_v22 = vld [vmem:[%s592_s0 + $0x28] sm:$0xf]  ;;  %v25_v23 = vld [vmem:[%s592_s0 + $0x2c] sm:$0xf]  ;;  %v19_v24 = vld [vmem:[%s592_s0 + $0x14] sm:$0xf]  ;;  %v32_v27 = vmax.bf16 %v428_v6, %v16_v19  ;;  %v33_v28 = vmax.bf16 %v428_v6, %v17_v20  ;;  %v34_v29 = vmax.bf16 %v428_v6, %v18_v21 }
   0x7   :  { %374 = vmatpush3.bf16.msra.mxu0 %v421_v1  ;;  %412 = vmatpush3.bf16.msra.mxu1 %v421_v1  ;;  %v26_v25 = vld [vmem:[%s592_s0 + $0x30] sm:$0xf]  ;;  %v27_v26 = vld [vmem:[%s592_s0 + $0x34] sm:$0xf]  ;;  %v40_v30 = vmax.bf16 %v428_v6, %v24_v22  ;;  %v41_v31 = vmax.bf16 %v428_v6, %v25_v23  ;;  %v35_v32 = vmax.bf16 %v428_v6, %v19_v24  ;;  %v20_v36 = vld [vmem:[%s592_s0 + $0x18] sm:$0xf] }
   0x8   :  { %375 = vmatprep.subr.bf16.mxu0 %v422_v2  ;;  %405 = vmatprep.subr.bf16.mxu1 %v422_v2  ;;  %v42_v33 = vmax.bf16 %v428_v6, %v26_v25  ;;  %v43_v34 = vmax.bf16 %v428_v6, %v27_v26  ;;  %v340_v35 = vcombine.low %v32_v27, %v33_v28  ;;  %v21_v39 = vld [vmem:[%s592_s0 + $0x1c] sm:$0xf]  ;;  %v28_v41 = vld [vmem:[%s592_s0 + $0x38] sm:$0xf] }
   0x9   :  { %387 = vmatprep.mubr.bf16.mxu0 %v339_v10  ;;  %395 = vmatprep.mubr.bf16.mxu1 %v343_v15  ;;  %v344_v37 = vcombine.low %v40_v30, %v41_v31  ;;  %v341_v38 = vcombine.low %v34_v29, %v35_v32  ;;  %v29_v42 = vld [vmem:[%s592_s0 + $0x3c] sm:$0xf]  ;;  %v36_v43 = vmax.bf16 %v428_v6, %v20_v36 }
   0xa   :  { %v345_v40 = vcombine.low %v42_v33, %v43_v34  ;;  %v37_v44 = vmax.bf16 %v428_v6, %v21_v39  ;;  %v44_v45 = vmax.bf16 %v428_v6, %v28_v41  ;;  %v45_v46 = vmax.bf16 %v428_v6, %v29_v42 }
   0xb   :  { %376 = vmatpush3.bf16.msra.mxu0 %v422_v2  ;;  %413 = vmatpush3.bf16.msra.mxu1 %v422_v2 }
   0xc   :  { %377 = vmatprep.subr.bf16.mxu0 %v423_v3  ;;  %406 = vmatprep.subr.bf16.mxu1 %v423_v3  ;;  %v342_v47 = vcombine.low %v36_v43, %v37_v44  ;;  %v346_v48 = vcombine.low %v44_v45, %v45_v46 }
   0xf   :  { %378 = vmatpush3.bf16.msra.mxu0 %v423_v3  ;;  %414 = vmatpush3.bf16.msra.mxu1 %v423_v3 }
  0x10   :  { %379 = vmatprep.subr.bf16.mxu0 %v424_v12  ;;  %407 = vmatprep.subr.bf16.mxu1 %v424_v12 }
  0x13   :  { %380 = vmatpush3.bf16.msra.mxu0 %v424_v12  ;;  %415 = vmatpush3.bf16.msra.mxu1 %v424_v12 }
  0x14   :  { %381 = vmatprep.subr.bf16.mxu0 %v425_v16  ;;  %408 = vmatprep.subr.bf16.mxu1 %v425_v16 }
  0x17   :  { %382 = vmatpush3.bf16.msra.mxu0 %v425_v16  ;;  %416 = vmatpush3.bf16.msra.mxu1 %v425_v16 }
  0x18   :  { %383 = vmatprep.subr.bf16.mxu0 %v426_v17  ;;  %409 = vmatprep.subr.bf16.mxu1 %v426_v17 }
  0x1b   :  { %384 = vmatpush3.bf16.msra.mxu0 %v426_v17  ;;  %417 = vmatpush3.bf16.msra.mxu1 %v426_v17 }
  0x1c   :  { %385 = vmatprep.subr.bf16.mxu0 %v427_v18  ;;  %410 = vmatprep.subr.bf16.mxu1 %v427_v18 }
  0x1f   :  { %386 = vmatpush3.bf16.msra.mxu0 %v427_v18  ;;  %418 = vmatpush3.bf16.msra.mxu1 %v427_v18 }
  0x22   :  { %388 = vmatmul.mubr.bf16.vlgmr.msra.gmra.mrb[0].mxu0 %v340_v35  ;;  %396 = vmatmul.mubr.bf16.vlgmr.msra.gmra.mrb[0].mxu1 %v344_v37 }
  0x23   :  { %391 = vmatprep.mubr.bf16.mxu0 %v341_v38  ;;  %399 = vmatprep.mubr.bf16.mxu1 %v345_v40 }
  0x2a   :  { %392 = vmatmul.mubr.bf16.gmra.mrb[4].mxu0 %v342_v47  ;;  %400 = vmatmul.mubr.bf16.gmra.mrb[4].mxu1 %v346_v48 }
  0xf5   :  { %v389_v49 = vpop.f32.mrb[0].mxu0  ;;  %v397_v50 = vpop.f32.mrb[0].mxu1 }
  0xf6   :  { %257 = vst [vmem:[%s593_s2 + $0x10] sm:$0xff] %v389_v49  ;;  %v192_v51 = vpop.f32.mrb[1].mxu0  ;;  %265 = vst [vmem:[%s593_s2 + $0x50] sm:$0xff] %v397_v50  ;;  %v224_v52 = vpop.f32.mrb[1].mxu1  ;;  %v295_v60 = vmul.f32 %v389_v49, %v389_v49  ;;  %v303_v28 = vmul.f32 %v397_v50, %v397_v50 }
  0xf7   :  { %255 = vst [vmem:[%s593_s2] sm:$0xff] %v192_v51  ;;  %v390_v53 = vpop.f32.mrb[2].mxu0  ;;  %263 = vst [vmem:[%s593_s2 + $0x40] sm:$0xff] %v224_v52  ;;  %v398_v54 = vpop.f32.mrb[2].mxu1  ;;  %v293_v57 = vmul.f32 %v192_v51, %v192_v51  ;;  %v301_v22 = vmul.f32 %v224_v52, %v224_v52 }
  0xf8   :  { %258 = vst [vmem:[%s593_s2 + $0x18] sm:$0xff] %v390_v53  ;;  %v195_v55 = vpop.f32.mrb[3].mxu0  ;;  %266 = vst [vmem:[%s593_s2 + $0x58] sm:$0xff] %v398_v54  ;;  %v227_v56 = vpop.f32.mrb[3].mxu1  ;;  %v296_v63 = vmul.f32 %v390_v53, %v390_v53  ;;  %v304_v31 = vmul.f32 %v398_v54, %v398_v54 }
  0xf9   :  { %256 = vst [vmem:[%s593_s2 + $0x8] sm:$0xff] %v195_v55  ;;  %v271_v58 = vadd.f32 %v195_v55, %v192_v51  ;;  %v294_v59 = vmul.f32 %v195_v55, %v195_v55  ;;  %264 = vst [vmem:[%s593_s2 + $0x48] sm:$0xff] %v227_v56  ;;  %v302_v27 = vmul.f32 %v227_v56, %v227_v56 }
  0xfb   :  { %v272_v61 = vadd.f32 %v389_v49, %v271_v58  ;;  %v309_v62 = vadd.f32 %v294_v59, %v293_v57 }
  0xfd   :  { %v310_v0 = vadd.f32 %v309_v62, %v295_v60  ;;  %v393_v1 = vpop.f32.mrb[4].mxu0  ;;  %v273_v2 = vadd.f32 %v390_v53, %v272_v61  ;;  %v401_v3 = vpop.f32.mrb[4].mxu1 }
  0xfe   :  { %261 = vst [vmem:[%s593_s2 + $0x30] sm:$0xff] %v393_v1  ;;  %v208_v4 = vpop.f32.mrb[5].mxu0  ;;  %269 = vst [vmem:[%s593_s2 + $0x70] sm:$0xff] %v401_v3  ;;  %v240_v5 = vpop.f32.mrb[5].mxu1  ;;  %v299_v16 = vmul.f32 %v393_v1, %v393_v1  ;;  %v307_v40 = vmul.f32 %v401_v3, %v401_v3 }
  0xff   :  { %259 = vst [vmem:[%s593_s2 + $0x20] sm:$0xff] %v208_v4  ;;  %v274_v6 = vadd.f32 %v273_v2, %v208_v4  ;;  %v297_v7 = vmul.f32 %v208_v4, %v208_v4  ;;  %v311_v8 = vadd.f32 %v310_v0, %v296_v63  ;;  %v394_v9 = vpop.f32.mrb[6].mxu0  ;;  %267 = vst [vmem:[%s593_s2 + $0x60] sm:$0xff] %v240_v5  ;;  %v402_v10 = vpop.f32.mrb[6].mxu1 }
 0x100   :  { %262 = vst [vmem:[%s593_s2 + $0x38] sm:$0xff] %v394_v9  ;;  %v211_v11 = vpop.f32.mrb[7].mxu0  ;;  %270 = vst [vmem:[%s593_s2 + $0x78] sm:$0xff] %v402_v10  ;;  %v243_v12 = vpop.f32.mrb[7].mxu1  ;;  %v300_v19 = vmul.f32 %v394_v9, %v394_v9  ;;  %v305_v34 = vmul.f32 %v240_v5, %v240_v5  ;;  %v308_v43 = vmul.f32 %v402_v10, %v402_v10 }
 0x101   :  { %v312_v13 = vadd.f32 %v311_v8, %v297_v7  ;;  %260 = vst [vmem:[%s593_s2 + $0x28] sm:$0xff] %v211_v11  ;;  %v275_v14 = vadd.f32 %v274_v6, %v211_v11  ;;  %v298_v15 = vmul.f32 %v211_v11, %v211_v11  ;;  %268 = vst [vmem:[%s593_s2 + $0x68] sm:$0xff] %v243_v12 }
 0x102   :  { %v306_v39 = vmul.f32 %v243_v12, %v243_v12 }
 0x103   :  { %v276_v17 = vadd.f32 %v393_v1, %v275_v14  ;;  %v313_v18 = vadd.f32 %v312_v13, %v298_v15 }
 0x105   :  { %v314_v20 = vadd.f32 %v313_v18, %v299_v16  ;;  %v277_v21 = vadd.f32 %v394_v9, %v276_v17 }
 0x107   :  { %v278_v23 = vadd.f32 %v277_v21, %v224_v52  ;;  %v315_v24 = vadd.f32 %v314_v20, %v300_v19 }
 0x109   :  { %v316_v25 = vadd.f32 %v315_v24, %v301_v22  ;;  %v279_v26 = vadd.f32 %v278_v23, %v227_v56 }
 0x10b   :  { %v280_v29 = vadd.f32 %v397_v50, %v279_v26  ;;  %v317_v30 = vadd.f32 %v316_v25, %v302_v27 }
 0x10d   :  { %v318_v32 = vadd.f32 %v317_v30, %v303_v28  ;;  %v281_v33 = vadd.f32 %v398_v54, %v280_v29 }
 0x10f   :  { %v282_v35 = vadd.f32 %v281_v33, %v240_v5  ;;  %v319_v36 = vadd.f32 %v318_v32, %v304_v31 }
 0x111   :  { %v320_v37 = vadd.f32 %v319_v36, %v305_v34  ;;  %v283_v38 = vadd.f32 %v282_v35, %v243_v12 }
 0x113   :  { %v284_v41 = vadd.f32 %v401_v3, %v283_v38  ;;  %v321_v42 = vadd.f32 %v320_v37, %v306_v39 }
 0x115   :  { %v285_v44 = vadd.f32 %v402_v10, %v284_v41  ;;  %v322_v45 = vadd.f32 %v321_v42, %v307_v40 }
 0x117   :  { %v286_v46 = vrot.slane %v285_v44, 4  ;;  %v323_v47 = vadd.f32 %v322_v45, %v308_v43 }
 0x119   :  { %v287_v48 = vadd.f32 %v286_v46, %v285_v44  ;;  %v324_v49 = vrot.slane %v323_v47, 4 }
 0x11b   :  { %v288_v50 = vrot.slane %v287_v48, 2  ;;  %v325_v51 = vadd.f32 %v324_v49, %v323_v47 }
 0x11d   :  { %v289_v52 = vadd.f32 %v288_v50, %v287_v48  ;;  %v326_v53 = vrot.slane %v325_v51, 2 }
 0x11f   :  { %v290_v54 = vrot.slane %v289_v52, 1  ;;  %v327_v55 = vadd.f32 %v326_v53, %v325_v51 }
 0x121   :  { %v291_v56 = vadd.f32 %v290_v54, %v289_v52  ;;  %v328_v57 = vrot.slane %v327_v55, 1 }
 0x123   :  { %292 = vst [vmem:[%s594_s3] sm:$0x1] %v291_v56  ;;  %v329_v58 = vadd.f32 %v328_v57, %v327_v55 }
 0x125   :  { %330 = vst [vmem:[%s594_s3 + $0x1] sm:$0x1] %v329_v58 }

</bundles_post_ra>
